<compile_context>
chip_gen: v5e
topology: v5e:2x2
jax: 0.10.0
libtpu: 0.0.40
codegen_flags: <defaults>
</compile_context>

<pallas_src>
import math

import jax
import jax.numpy as jnp
from jax.experimental import pallas as pl
from jax.experimental.pallas import tpu as pltpu


def _round_up(x, m):
    return ((x + m - 1) // m) * m


def _logreg_kernel(x_ref, wt_ref, b_ref, o_ref):
    # x_ref : (tm, ft_in)      VMEM tile of input rows
    # wt_ref: (ft_in, c_pad)   pre-transposed weight (constant block across grid)
    # b_ref : (1, c_pad)       bias, padded to lane-dense width
    # o_ref : (tm, c_pad)
    acc = jnp.dot(x_ref[...], wt_ref[...], preferred_element_type=jnp.float32)
    o_ref[...] = (acc + b_ref[...]).astype(o_ref.dtype)


def logreg_forward(seq, weight, bias, *, tm=512,
                   vmem_budget_bytes=24 * 1024 * 1024,
                   compute_dtype=None):
    """seq: (N, ft_in), weight: (nb_classes, ft_in), bias: (nb_classes,).

    compute_dtype: optionally cast seq/weight (e.g. jnp.bfloat16) to halve HBM
    traffic on this memory-bound kernel; accumulation stays in f32.
    """
    n, ft_in = seq.shape
    nb_classes = weight.shape[0]
    out_dtype = seq.dtype

    if compute_dtype is not None:
        seq = seq.astype(compute_dtype)
        weight = weight.astype(compute_dtype)

    # Lane-dense output: pad the class dim to a multiple of 128.
    c_pad = _round_up(nb_classes, 128)

    # One-time weight transpose + pad (outside the kernel), padded bias.
    wt = jnp.zeros((ft_in, c_pad), dtype=weight.dtype).at[:, :nb_classes].set(weight.T)
    b2 = jnp.zeros((1, c_pad), dtype=jnp.float32).at[0, :nb_classes].set(
        bias.astype(jnp.float32))

    # Pick the largest row tile that fits a conservative VMEM budget:
    # double-buffered input + output tiles + the resident (constant-index) weight.
    in_isz = seq.dtype.itemsize
    out_isz = jnp.dtype(out_dtype).itemsize
    fixed = ft_in * c_pad * weight.dtype.itemsize + c_pad * 4  # weight + bias
    per_row = 2 * ft_in * in_isz + 2 * c_pad * out_isz         # double-buffered in/out
    tm_fit = max(8, (vmem_budget_bytes - fixed) // max(per_row, 1))
    tm = int(min(tm, tm_fit))
    tm = min(tm, _round_up(n, 8))            # don't over-pad tiny inputs
    if tm >= 256:
        tm = (tm // 256) * 256               # MXU/lane-friendly big tiles
    else:
        tm = max(8, (tm // 8) * 8)           # sublane multiple

    # Ragged N: pad rows up to a multiple of tm (layout plumbing in the wrapper).
    n_pad = _round_up(n, tm)
    if n_pad != n:
        seq = jnp.zeros((n_pad, ft_in), dtype=seq.dtype).at[:n].set(seq)

    grid = (n_pad // tm,)

    # Explicit, generation-safe VMEM limit (keeps double-buffering intact on v7x).
    vmem_limit = int(min(max(fixed + tm * per_row + (4 << 20), 32 << 20), 100 << 20))

    out = pl.pallas_call(
        _logreg_kernel,
        out_shape=jax.ShapeDtypeStruct((n_pad, c_pad), out_dtype),
        grid_spec=pltpu.PrefetchScalarGridSpec(
            num_scalar_prefetch=0,
            grid=grid,
            in_specs=[
                pl.BlockSpec((tm, ft_in), lambda i: (i, 0)),
                pl.BlockSpec((ft_in, c_pad), lambda i: (0, 0)),
                pl.BlockSpec((1, c_pad), lambda i: (0, 0)),
            ],
            out_specs=pl.BlockSpec((tm, c_pad), lambda i: (i, 0)),
        ),
        compiler_params=pltpu.CompilerParams(
            dimension_semantics=("parallel",),
            vmem_limit_bytes=vmem_limit,
        ),
    )(seq, wt, b2)

    return out[:n, :nb_classes]


def init_logreg_params(key, ft_in, nb_classes, dtype=jnp.float32):
    # xavier_uniform_: U(-a, a), a = sqrt(6 / (fan_in + fan_out))
    bound = math.sqrt(6.0 / (ft_in + nb_classes))
    weight = jax.random.uniform(
        key, (nb_classes, ft_in), dtype=dtype, minval=-bound, maxval=bound
    )
    bias = jnp.zeros((nb_classes,), dtype=dtype)  # bias.data.fill_(0.0)
    return weight, bias


if __name__ == "__main__":
    key = jax.random.PRNGKey(0)
    k_x, k_w, k_x2, k_w2 = jax.random.split(key, 4)

    # Small shapes consistent with the module.
    N, FT_IN, NB_CLASSES = 16, 32, 8
    seq = jax.random.normal(k_x, (N, FT_IN), dtype=jnp.float32)
    weight, bias = init_logreg_params(k_w, FT_IN, NB_CLASSES)

    out = logreg_forward(seq, weight, bias)
    out = jax.block_until_ready(out)

    ref = seq @ weight.T + bias
    assert out.shape == (N, NB_CLASSES)
    assert jnp.allclose(out, ref, atol=1e-5, rtol=1e-5)

    # Second check: ragged N (not a multiple of the tile) exercises the padding path.
    N2, FT_IN2, NB_CLASSES2 = 300, 64, 10
    seq2 = jax.random.normal(k_x2, (N2, FT_IN2), dtype=jnp.float32)
    weight2, bias2 = init_logreg_params(k_w2, FT_IN2, NB_CLASSES2)
    bias2 = bias2 + 0.5  # non-zero bias to verify the add path

    out2 = jax.block_until_ready(logreg_forward(seq2, weight2, bias2))
    ref2 = seq2 @ weight2.T + bias2
    assert out2.shape == (N2, NB_CLASSES2)
    assert jnp.allclose(out2, ref2, atol=1e-5, rtol=1e-5)

    print("KERNEL_OK")
</pallas_src>

<mosaic_0001>
module attributes {stable_mosaic.version = 11 : i64} {
  func.func @_logreg_kernel(%arg0: i32, %arg1: memref<16x32xf32, #tpu.memory_space<vmem>>, %arg2: memref<32x128xf32, #tpu.memory_space<vmem>>, %arg3: memref<1x128xf32, #tpu.memory_space<vmem>>, %arg4: memref<16x128xf32, #tpu.memory_space<vmem>>) attributes {dimension_semantics = [#tpu.dimension_semantics<parallel>], iteration_bounds = array<i64: 1>, scalar_prefetch = 0 : i64, scratch_operands = 0 : i64, tpu.core_type = #tpu.core_type<tc>, window_params = [{transform_indices = @transform_0, window_bounds = array<i64: 16, 32>}, {pipeline_mode = #tpu.pipeline_mode<synchronous>, transform_indices = @transform_1, window_bounds = array<i64: 32, 128>}, {pipeline_mode = #tpu.pipeline_mode<synchronous>, transform_indices = @transform_2, window_bounds = array<i64: 1, 128>}, {transform_indices = @transform_3, window_bounds = array<i64: 16, 128>}]} {
    %c0 = arith.constant 0 : index
    %c0_0 = arith.constant 0 : index
    %0 = vector.load %arg1[%c0, %c0_0] : memref<16x32xf32, #tpu.memory_space<vmem>>, vector<16x32xf32>
    %c0_1 = arith.constant 0 : index
    %c0_2 = arith.constant 0 : index
    %1 = vector.load %arg2[%c0_1, %c0_2] : memref<32x128xf32, #tpu.memory_space<vmem>>, vector<32x128xf32>
    %cst = arith.constant dense<0.000000e+00> : vector<16x128xf32>
    %2 = tpu.matmul %0, %1, %cst {dimension_numbers = #tpu.dot_dimension_numbers<[1], [0], [0], [1], [0, 0, 1, 1], [], []>} : vector<16x32xf32>, vector<32x128xf32>, vector<16x128xf32> -> vector<16x128xf32>
    %c0_3 = arith.constant 0 : index
    %c0_4 = arith.constant 0 : index
    %3 = vector.load %arg3[%c0_3, %c0_4] : memref<1x128xf32, #tpu.memory_space<vmem>>, vector<1x128xf32>
    %4 = vector.broadcast %3 : vector<1x128xf32> to vector<16x128xf32>
    %5 = arith.addf %2, %4 : vector<16x128xf32>
    %c0_5 = arith.constant 0 : index
    %c0_6 = arith.constant 0 : index
    %6 = vector.load %arg4[%c0_5, %c0_6] : memref<16x128xf32, #tpu.memory_space<vmem>>, vector<16x128xf32>
    tpu.vector_store %arg4[%c0_5, %c0_6], %5 {strides = array<i32>} : memref<16x128xf32, #tpu.memory_space<vmem>>, vector<16x128xf32>,
    return
  }
  func.func @transform_0(%arg0: i32) -> (i32, i32) {
    %c0_i32 = arith.constant 0 : i32
    %c0_i32_0 = arith.constant 0 : i32
    return %arg0, %c0_i32 : i32, i32
  }
  func.func @transform_1(%arg0: i32) -> (i32, i32) {
    %c0_i32 = arith.constant 0 : i32
    %c0_i32_0 = arith.constant 0 : i32
    %c0_i32_1 = arith.constant 0 : i32
    return %c0_i32, %c0_i32_0 : i32, i32
  }
  func.func @transform_2(%arg0: i32) -> (i32, i32) {
    %c0_i32 = arith.constant 0 : i32
    %c0_i32_0 = arith.constant 0 : i32
    %c0_i32_1 = arith.constant 0 : i32
    return %c0_i32, %c0_i32_0 : i32, i32
  }
  func.func @transform_3(%arg0: i32) -> (i32, i32) {
    %c0_i32 = arith.constant 0 : i32
    %c0_i32_0 = arith.constant 0 : i32
    return %arg0, %c0_i32 : i32, i32
  }
}

</mosaic_0001>

<bundles_post_ra>
// kernel: tpu_custom_call.1
= control target key start
LH: loop header
LB: loop body
LE: loop exit
PB: predicated region body
PF: predicated region fallthrough
CT: control target
= control target key end

     0   :  { %8 = vsyncpa [#allocation3], 0  ;;  %s245_s0 = inlined_call_operand.hbm [shape: f32[16,32], index: 0, kind: input, shape index: {}]   ;;  %s246_s1 = inlined_call_operand.hbm [shape: f32[32,128], index: 1, kind: input, shape index: {}]   ;;  %s247_s2 = inlined_call_operand.vmem [shape: f32[1,128], index: 2, kind: input, shape index: {}]   ;;  %s248_s3 = inlined_call_operand.hbm [shape: f32[16,128], index: 3, kind: output, shape index: {}]  }
   0x1   :  { %9 = vsyncpa [#allocation6], 0 }
   0x2   :  { %10 = vsyncpa [#allocation4], 0  ;;  %s15_s14 = sshll.u32 %s245_s0, 4  ;;  %s199_s15 = smov [#allocation2]   ;;  %s16_s14 = int_to_ptr.hbm [resolvable:$true] %s15_s14 }
   0x3   :  { %s17_s16 = sshll.u32 %s199_s15, 4  ;;  %s28_s19 = sshll.u32 %s246_s1, 4  ;;  %s18_s16 = int_to_ptr.vmem [resolvable:$true] %s17_s16  ;;  %s29_s19 = int_to_ptr.hbm [resolvable:$true] %s28_s19 }
   0x4   :  { %s200_s20 = smov 128   ;;  %s201_s21 = smov 8  }
   0x5   :  { %23 = dma.hbm_to_vmem [thread:$0]  %s16_s14, 256, %s18_s16, [#allocation3], %s200_s20, %s200_s20, %s201_s21  }
   0x6   :  { %s202_s22 = smov [#allocation5]  }
   0x7   :  { %s30_s23 = sshll.u32 %s202_s22, 4  ;;  %s31_s23 = int_to_ptr.vmem [resolvable:$true] %s30_s23 }
   0x8   :  { %36 = dma.hbm_to_vmem [thread:$0]  %s29_s19, 512, %s31_s23, [#allocation6], %s200_s20, %s200_s20, %s201_s21  }
   0x9   :  { %193 = dma.done.wait [#allocation3], 256  }
   0xa   :  { %194 = vsyncadd [#allocation3], 4294967040 }
   0xb   :  { %195 = dma.done.wait [#allocation6], 512  }
   0xc   :  { %196 = vsyncadd [#allocation6], 4294966784  ;;  %v52_v0 = vld [vmem:[#allocation5 + $0x18] sm:$0xff]  ;;  %v51_v1 = vld [vmem:[#allocation5 + $0x10] sm:$0xff]  ;;  %vm57_vm0 = vcmask 261120   ;;  %s203_s24 = smov [#allocation7]  }
   0xd   :  { %76 = vmatpush.msra.mxu0 %v52_v0  ;;  %111 = vmatpush.msra.mxu1 %v52_v0  ;;  %v50_v2 = vld [vmem:[#allocation5 + $0x8] sm:$0xff]  ;;  %v49_v3 = vld [vmem:[#allocation5] sm:$0xff]  ;;  %v47_v4 = vld [vmem:[#allocation2] sm:$0xff]  ;;  %s93_s25 = sshll.u32 %s203_s24, 4  ;;  %s95_s28 = sshll.u32 %s248_s3, 4  ;;  %s94_s25 = int_to_ptr.vmem [resolvable:$true] %s93_s25  ;;  %s96_s28 = int_to_ptr.hbm [resolvable:$true] %s95_s28 }
   0xe   :  { %v48_v5 = vld [vmem:[#allocation2 + $0x8] sm:$0xff]  ;;  %v120_v6 = vld [vmem:[%s247_s2] ss:$0 sm:$0xff] }
   0xf   :  { %77 = vmatpush.msra.mxu0 %v51_v1  ;;  %112 = vmatpush.msra.mxu1 %v51_v1 }
  0x11   :  { %78 = vmatpush.msra.mxu0 %v50_v2  ;;  %113 = vmatpush.msra.mxu1 %v50_v2 }
  0x13   :  { %79 = vmatpush.msra.mxu0 %v49_v3  ;;  %114 = vmatpush.msra.mxu1 %v49_v3 }
  0x14   :  { %109 = vmatmul.msk.f32.vlgmr.msra.gmra.mxu0 %vm57_vm0, %v47_v4  ;;  %110 = vmatmul.msk.f32.vlgmr.msra.gmra.mxu1 %vm57_vm0, %v48_v5 }
  0x91   :  { %v81_v7 = vpop.f32.mrf.mxu0  ;;  %v84_v8 = vpop.f32.mrf.mxu1 }
  0x92   :  { %v82_v9 = vadd.f32 %v120_v6, %v81_v7  ;;  %v85_v10 = vadd.f32 %v120_v6, %v84_v8 }
  0x94   :  { %87 = vst [vmem:[#allocation7] sm:$0xff] %v82_v9 }
  0x95   :  { %88 = vst [vmem:[#allocation7 + $0x8] sm:$0xff] %v85_v10 }
  0x96   :  { %101 = dma.vmem_to_hbm [thread:$0]  %s94_s25, 256, %s96_s28, [#allocation4], %s200_s20, %s200_s20, %s201_s21  }
  0x97   :  { %197 = dma.done.wait [#allocation4], 256  }
  0x98   :  { %198 = vsyncadd [#allocation4], 4294967040 }
  0x99   :  { %106 = vsyncpa [#allocation3], 1 }
  0x9a   :  { %107 = vsyncpa [#allocation6], 1 }
  0x9b   :  { %108 = vsyncpa [#allocation4], 1 }

</bundles_post_ra>
